<compile_context>
chip_gen: v7x
topology: tpu7x:2x2x1
jax: 0.10.0
libtpu: 0.0.40
codegen_flags: <defaults>
</compile_context>

<pallas_src>
import functools

import numpy as np
import jax
import jax.numpy as jnp
from jax.experimental import pallas as pl
from jax.experimental.pallas import tpu as pltpu

EPS = 1e-5


def basic_block_kernel(x_ref, w1_ref, w2_ref, pool_ref,
                       g1_ref, bt1_ref, g2_ref, bt2_ref,
                       o_ref, *, img_rows, inv_count):
    # x_ref    : (NH, WC)     f32  -- N*H image rows, each flattened to W*C lanes
    # w*_ref   : (3, WC, WC)  bf16 -- per-dy block-Toeplitz (im2col) conv weights
    # pool_ref : (WC, WC)     bf16 -- 0/1 per-channel pooling matrix
    # g*/bt*   : (1, WC)      f32  -- BN gamma/beta tiled across the W positions
    # o_ref    : (NH, WC)     f32
    NH, WC = x_ref.shape
    H = img_rows

    pool = pool_ref[...].astype(jnp.float32)

    # Per-image boundary masks for the dy = -1 / +1 row taps (zero padding in H).
    row = jax.lax.broadcasted_iota(jnp.int32, (NH, WC), 0)
    ok_up = (row % H) != 0          # a row above exists within the same image
    ok_dn = (row % H) != (H - 1)    # a row below exists within the same image

    def conv_bn_relu(inp, w_ref, g_ref, bt_ref):
        # inp: (NH, WC) f32.  Row taps via sublane rotation + boundary masking
        # (no halo scratch, no strided copies).
        up = jnp.where(ok_up, pltpu.roll(inp, shift=1, axis=0), 0.0)
        dn = jnp.where(ok_dn, pltpu.roll(inp, shift=NH - 1, axis=0), 0.0)

        # 3x3 conv == three (NH,WC)x(WC,WC) MXU dots; the 3 dx taps and the
        # W-edge zero padding are folded into each per-dy band matrix.
        acc = jnp.dot(up.astype(jnp.bfloat16), w_ref[0],
                      preferred_element_type=jnp.float32)
        acc += jnp.dot(inp.astype(jnp.bfloat16), w_ref[1],
                       preferred_element_type=jnp.float32)
        acc += jnp.dot(dn.astype(jnp.bfloat16), w_ref[2],
                       preferred_element_type=jnp.float32)
        # (conv bias omitted: cancelled exactly by BN's batch-mean subtraction)

        # Training-mode BN stats (biased variance) over (N, H, W) per channel,
        # kept lane-dense: sublane row-reduction + per-channel pooling matmul.
        sums = jnp.concatenate(
            [jnp.sum(acc, axis=0, keepdims=True),
             jnp.sum(acc * acc, axis=0, keepdims=True)], axis=0)   # (2, WC)
        stats = jnp.dot(sums, pool,
                        preferred_element_type=jnp.float32) * inv_count
        mean = stats[0:1, :]
        var = stats[1:2, :] - mean * mean
        scale = g_ref[...] * jax.lax.rsqrt(var + EPS)              # (1, WC)
        shift = bt_ref[...] - mean * scale
        return jnp.maximum(acc * scale + shift, 0.0)               # (NH, WC)

    x = x_ref[...]
    out1 = conv_bn_relu(x, w1_ref, g1_ref, bt1_ref)
    out2 = conv_bn_relu(out1, w2_ref, g2_ref, bt2_ref)

    # Residual add + final ReLU; lane-dense (last dim = WC) unmasked store.
    o_ref[...] = jnp.maximum(out2 + x, 0.0)


def _band_select(W, KW=3):
    """Trace-time numpy selector: sel[dx, xi, xo] = 1 iff the conv's dx tap at
    output column xo reads input column xi (W-edge zero padding -> no entry)."""
    sel = np.zeros((KW, W, W), np.float32)
    for dx in range(KW):
        for xo in range(W):
            xi = xo + dx - 1
            if 0 <= xi < W:
                sel[dx, xi, xo] = 1.0
    return sel


def _pack_conv_weights(w_oihw, sel):
    """OIHW (Cout, Cin, 3, 3) conv weights -> (3, W*Cin, W*Cout) bf16 per-dy
    block-Toeplitz matrices: rows (x_in, ci), cols (x_out, co); the band folds
    the 3 dx taps and the W-edge zero padding.  Pure jnp (runs under jit)."""
    KH, W = sel.shape[0], sel.shape[1]
    Cout, Cin = w_oihw.shape[0], w_oihw.shape[1]
    big = jnp.einsum("dab,oiyd->yaibo", jnp.asarray(sel), w_oihw)
    return big.reshape(KH, W * Cin, W * Cout).astype(jnp.bfloat16)


def _full_spec(shape):
    return pl.BlockSpec(shape, lambda i, _n=len(shape): (0,) * _n)


@jax.jit
def basic_block_forward(x_nchw, params):
    """Public API matches PyTorch: x is NCHW float32; returns NCHW.  The whole
    wrapper (layout glue + weight packing + pallas_call) runs under one jit, so
    nothing dispatches eagerly or syncs to the host per call."""
    N, Cin, H, W = x_nchw.shape
    Cout = params["w1"].shape[0]
    assert Cin == Cout, "downsample=False requires in_maps == out_maps"
    C = Cout
    WC = W * C          # lanes of one flattened image row (128 in the demo)
    NH = N * H

    # Glue: NCHW -> lane-dense (N*H, W*C) row layout (no spatial padding).
    x_rows = jnp.transpose(x_nchw, (0, 2, 3, 1)).reshape(NH, WC)
    x_rows = x_rows.astype(jnp.float32)

    # Weight / BN-parameter packing in jnp under jit; `sel` / `lane_ch` are
    # trace-time constants that depend only on static shapes.
    sel = _band_select(W)
    w1_big = _pack_conv_weights(params["w1"], sel)
    w2_big = _pack_conv_weights(params["w2"], sel)
    lane_ch = np.arange(WC) % C
    pool = jnp.asarray((lane_ch[:, None] == lane_ch[None, :]).astype(np.float32),
                       dtype=jnp.bfloat16)                 # 0/1 channel-match
    g1 = jnp.tile(params["g1"], W).reshape(1, WC)
    g2 = jnp.tile(params["g2"], W).reshape(1, WC)
    bt1 = jnp.tile(params["bt1"], W).reshape(1, WC)
    bt2 = jnp.tile(params["bt2"], W).reshape(1, WC)
    # conv biases b1/b2 are intentionally not passed: BN cancels them exactly.

    kernel = functools.partial(basic_block_kernel,
                               img_rows=H,
                               inv_count=1.0 / float(N * H * W))

    args = (x_rows, w1_big, w2_big, pool, g1, bt1, g2, bt2)
    out_rows = pl.pallas_call(
        kernel,
        out_shape=jax.ShapeDtypeStruct((NH, WC), jnp.float32),
        grid=(1,),
        in_specs=[_full_spec(a.shape) for a in args],
        out_specs=_full_spec((NH, WC)),
        compiler_params=pltpu.CompilerParams(
            dimension_semantics=("arbitrary",),
            vmem_limit_bytes=32 * 1024 * 1024),
    )(*args)

    return jnp.transpose(out_rows.reshape(N, H, W, C), (0, 3, 1, 2))


def reference_forward(x, p):
    """Pure-JAX reference (NCHW, PyTorch training-mode BN, conv bias included)."""
    def conv(y, w, b):
        z = jax.lax.conv_general_dilated(
            y, w, (1, 1), ((1, 1), (1, 1)),
            dimension_numbers=("NCHW", "OIHW", "NCHW"))
        return z + b[None, :, None, None]

    def bn(y, g, bt):
        m = jnp.mean(y, axis=(0, 2, 3), keepdims=True)
        v = jnp.mean((y - m) ** 2, axis=(0, 2, 3), keepdims=True)
        return (y - m) * jax.lax.rsqrt(v + EPS) * g[None, :, None, None] \
            + bt[None, :, None, None]

    out = jax.nn.relu(bn(conv(x, p["w1"], p["b1"]), p["g1"], p["bt1"]))
    out = jax.nn.relu(bn(conv(out, p["w2"], p["b2"]), p["g2"], p["bt2"]))
    return jax.nn.relu(out + x)


if __name__ == "__main__":
    # small shapes consistent with the module (downsample=False -> Cin == Cout);
    # W*C = 16*8 = 128 gives an exactly lane-dense row layout.
    N, C, H, W = 2, 8, 16, 16
    key = jax.random.PRNGKey(0)
    ks = jax.random.split(key, 9)

    params = {
        "w1": 0.2 * jax.random.normal(ks[0], (C, C, 3, 3), jnp.float32),
        "b1": 0.1 * jax.random.normal(ks[1], (C,), jnp.float32),
        "g1": 1.0 + 0.1 * jax.random.normal(ks[2], (C,), jnp.float32),
        "bt1": 0.1 * jax.random.normal(ks[3], (C,), jnp.float32),
        "w2": 0.2 * jax.random.normal(ks[4], (C, C, 3, 3), jnp.float32),
        "b2": 0.1 * jax.random.normal(ks[5], (C,), jnp.float32),
        "g2": 1.0 + 0.1 * jax.random.normal(ks[6], (C,), jnp.float32),
        "bt2": 0.1 * jax.random.normal(ks[7], (C,), jnp.float32),
    }
    x = jax.random.normal(ks[8], (N, C, H, W), jnp.float32)

    out = jax.block_until_ready(basic_block_forward(x, params))
    ref = jax.block_until_ready(reference_forward(x, params))

    assert out.shape == (N, C, H, W)
    # bf16 MXU operands (f32 accumulation) -> compare at a relaxed tolerance.
    max_err = float(jnp.max(jnp.abs(out - ref)))
    assert jnp.allclose(out, ref, atol=5e-2, rtol=5e-2), max_err

    print("KERNEL_OK")
</pallas_src>

<mosaic_0001>
module attributes {stable_mosaic.version = 11 : i64} {
  func.func @basic_block_kernel(%arg0: i32, %arg1: memref<32x128xf32, #tpu.memory_space<vmem>>, %arg2: memref<3x128x128xbf16, #tpu.memory_space<vmem>>, %arg3: memref<3x128x128xbf16, #tpu.memory_space<vmem>>, %arg4: memref<128x128xbf16, #tpu.memory_space<vmem>>, %arg5: memref<1x128xf32, #tpu.memory_space<vmem>>, %arg6: memref<1x128xf32, #tpu.memory_space<vmem>>, %arg7: memref<1x128xf32, #tpu.memory_space<vmem>>, %arg8: memref<1x128xf32, #tpu.memory_space<vmem>>, %arg9: memref<32x128xf32, #tpu.memory_space<vmem>>) attributes {dimension_semantics = [#tpu.dimension_semantics<arbitrary>], iteration_bounds = array<i64: 1>, scalar_prefetch = 0 : i64, scratch_operands = 0 : i64, tpu.core_type = #tpu.core_type<tc>, window_params = [{pipeline_mode = #tpu.pipeline_mode<synchronous>, transform_indices = @transform_0, window_bounds = array<i64: 32, 128>}, {pipeline_mode = #tpu.pipeline_mode<synchronous>, transform_indices = @transform_1, window_bounds = array<i64: 3, 128, 128>}, {pipeline_mode = #tpu.pipeline_mode<synchronous>, transform_indices = @transform_2, window_bounds = array<i64: 3, 128, 128>}, {pipeline_mode = #tpu.pipeline_mode<synchronous>, transform_indices = @transform_3, window_bounds = array<i64: 128, 128>}, {pipeline_mode = #tpu.pipeline_mode<synchronous>, transform_indices = @transform_4, window_bounds = array<i64: 1, 128>}, {pipeline_mode = #tpu.pipeline_mode<synchronous>, transform_indices = @transform_5, window_bounds = array<i64: 1, 128>}, {pipeline_mode = #tpu.pipeline_mode<synchronous>, transform_indices = @transform_6, window_bounds = array<i64: 1, 128>}, {pipeline_mode = #tpu.pipeline_mode<synchronous>, transform_indices = @transform_7, window_bounds = array<i64: 1, 128>}, {pipeline_mode = #tpu.pipeline_mode<synchronous>, transform_indices = @transform_8, window_bounds = array<i64: 32, 128>}]} {
    %c0 = arith.constant 0 : index
    %c0_0 = arith.constant 0 : index
    %0 = vector.load %arg4[%c0, %c0_0] : memref<128x128xbf16, #tpu.memory_space<vmem>>, vector<128x128xbf16>
    %1 = arith.extf %0 : vector<128x128xbf16> to vector<128x128xf32>
    %2 = tpu.iota {dimensions = array<i32: 0>} : vector<32x128xi32>
    %c16_i32 = arith.constant 16 : i32
    %c0_i32 = arith.constant 0 : i32
    %3 = arith.cmpi eq, %c16_i32, %c0_i32 : i32
    %c1_i32 = arith.constant 1 : i32
    %4 = arith.select %3, %c1_i32, %c16_i32 : i32
    %5 = vector.broadcast %4 : i32 to vector<32x128xi32>
    %6 = arith.remsi %2, %5 : vector<32x128xi32>
    %c0_i32_1 = arith.constant 0 : i32
    %7 = vector.broadcast %c0_i32_1 : i32 to vector<32x128xi32>
    %8 = arith.cmpi ne, %6, %7 : vector<32x128xi32>
    %c0_i32_2 = arith.constant 0 : i32
    %9 = vector.broadcast %c0_i32_2 : i32 to vector<32x128xi32>
    %10 = arith.cmpi slt, %6, %9 : vector<32x128xi32>
    %c0_i32_3 = arith.constant 0 : i32
    %11 = arith.cmpi slt, %4, %c0_i32_3 : i32
    %12 = vector.broadcast %11 : i1 to vector<32x128xi1>
    %13 = vector.broadcast %12 : vector<32x128xi1> to vector<32x128xi1>
    %14 = arith.xori %10, %13 : vector<32x128xi1>
    %15 = arith.andi %14, %8 : vector<32x128xi1>
    %16 = vector.broadcast %4 : i32 to vector<32x128xi32>
    %17 = arith.addi %6, %16 : vector<32x128xi32>
    %18 = arith.select %15, %17, %6 : vector<32x128xi1>, vector<32x128xi32>
    %c0_i32_4 = arith.constant 0 : i32
    %19 = vector.broadcast %c0_i32_4 : i32 to vector<32x128xi32>
    %20 = arith.cmpi ne, %18, %19 : vector<32x128xi32>
    %c16_i32_5 = arith.constant 16 : i32
    %c0_i32_6 = arith.constant 0 : i32
    %21 = arith.cmpi eq, %c16_i32_5, %c0_i32_6 : i32
    %c1_i32_7 = arith.constant 1 : i32
    %22 = arith.select %21, %c1_i32_7, %c16_i32_5 : i32
    %23 = vector.broadcast %22 : i32 to vector<32x128xi32>
    %24 = arith.remsi %2, %23 : vector<32x128xi32>
    %c0_i32_8 = arith.constant 0 : i32
    %25 = vector.broadcast %c0_i32_8 : i32 to vector<32x128xi32>
    %26 = arith.cmpi ne, %24, %25 : vector<32x128xi32>
    %c0_i32_9 = arith.constant 0 : i32
    %27 = vector.broadcast %c0_i32_9 : i32 to vector<32x128xi32>
    %28 = arith.cmpi slt, %24, %27 : vector<32x128xi32>
    %c0_i32_10 = arith.constant 0 : i32
    %29 = arith.cmpi slt, %22, %c0_i32_10 : i32
    %30 = vector.broadcast %29 : i1 to vector<32x128xi1>
    %31 = vector.broadcast %30 : vector<32x128xi1> to vector<32x128xi1>
    %32 = arith.xori %28, %31 : vector<32x128xi1>
    %33 = arith.andi %32, %26 : vector<32x128xi1>
    %34 = vector.broadcast %22 : i32 to vector<32x128xi32>
    %35 = arith.addi %24, %34 : vector<32x128xi32>
    %36 = arith.select %33, %35, %24 : vector<32x128xi1>, vector<32x128xi32>
    %c15_i32 = arith.constant 15 : i32
    %37 = vector.broadcast %c15_i32 : i32 to vector<32x128xi32>
    %38 = arith.cmpi ne, %36, %37 : vector<32x128xi32>
    %c0_11 = arith.constant 0 : index
    %c0_12 = arith.constant 0 : index
    %39 = vector.load %arg1[%c0_11, %c0_12] : memref<32x128xf32, #tpu.memory_space<vmem>>, vector<32x128xf32>
    %c1_i32_13 = arith.constant 1 : i32
    %40 = tpu.dynamic_rotate %39 by %c1_i32_13 dim 0 : vector<32x128xf32>, i32 -> vector<32x128xf32>
    %cst = arith.constant 0.000000e+00 : f32
    %41 = vector.broadcast %cst : f32 to vector<32x128xf32>
    %42 = arith.select %20, %40, %41 : vector<32x128xi1>, vector<32x128xf32>
    %c31_i32 = arith.constant 31 : i32
    %43 = tpu.dynamic_rotate %39 by %c31_i32 dim 0 : vector<32x128xf32>, i32 -> vector<32x128xf32>
    %cst_14 = arith.constant 0.000000e+00 : f32
    %44 = vector.broadcast %cst_14 : f32 to vector<32x128xf32>
    %45 = arith.select %38, %43, %44 : vector<32x128xi1>, vector<32x128xf32>
    %46 = arith.truncf %42 : vector<32x128xf32> to vector<32x128xbf16>
    %c0_15 = arith.constant 0 : index
    %c0_16 = arith.constant 0 : index
    %c0_17 = arith.constant 0 : index
    %47 = vector.load %arg2[%c0_15, %c0_16, %c0_17] : memref<3x128x128xbf16, #tpu.memory_space<vmem>>, vector<1x128x128xbf16>
    %48 = vector.shape_cast %47 : vector<1x128x128xbf16> to vector<128x128xbf16>
    %cst_18 = arith.constant dense<0.000000e+00> : vector<32x128xf32>
    %49 = tpu.matmul %46, %48, %cst_18 {dimension_numbers = #tpu.dot_dimension_numbers<[1], [0], [0], [1], [0, 0, 1, 1], [], []>} : vector<32x128xbf16>, vector<128x128xbf16>, vector<32x128xf32> -> vector<32x128xf32>
    %50 = arith.truncf %39 : vector<32x128xf32> to vector<32x128xbf16>
    %c1 = arith.constant 1 : index
    %c0_19 = arith.constant 0 : index
    %c0_20 = arith.constant 0 : index
    %51 = vector.load %arg2[%c1, %c0_19, %c0_20] : memref<3x128x128xbf16, #tpu.memory_space<vmem>>, vector<1x128x128xbf16>
    %52 = vector.shape_cast %51 : vector<1x128x128xbf16> to vector<128x128xbf16>
    %cst_21 = arith.constant dense<0.000000e+00> : vector<32x128xf32>
    %53 = tpu.matmul %50, %52, %cst_21 {dimension_numbers = #tpu.dot_dimension_numbers<[1], [0], [0], [1], [0, 0, 1, 1], [], []>} : vector<32x128xbf16>, vector<128x128xbf16>, vector<32x128xf32> -> vector<32x128xf32>
    %54 = arith.addf %49, %53 : vector<32x128xf32>
    %55 = arith.truncf %45 : vector<32x128xf32> to vector<32x128xbf16>
    %c2 = arith.constant 2 : index
    %c0_22 = arith.constant 0 : index
    %c0_23 = arith.constant 0 : index
    %56 = vector.load %arg2[%c2, %c0_22, %c0_23] : memref<3x128x128xbf16, #tpu.memory_space<vmem>>, vector<1x128x128xbf16>
    %57 = vector.shape_cast %56 : vector<1x128x128xbf16> to vector<128x128xbf16>
    %cst_24 = arith.constant dense<0.000000e+00> : vector<32x128xf32>
    %58 = tpu.matmul %55, %57, %cst_24 {dimension_numbers = #tpu.dot_dimension_numbers<[1], [0], [0], [1], [0, 0, 1, 1], [], []>} : vector<32x128xbf16>, vector<128x128xbf16>, vector<32x128xf32> -> vector<32x128xf32>
    %59 = arith.addf %54, %58 : vector<32x128xf32>
    %cst_25 = arith.constant dense<0.000000e+00> : vector<128xf32>
    %60 = vector.multi_reduction <add>, %59, %cst_25 [0] : vector<32x128xf32> to vector<128xf32>
    %61 = vector.shape_cast %60 : vector<128xf32> to vector<1x128xf32>
    %62 = arith.mulf %59, %59 : vector<32x128xf32>
    %cst_26 = arith.constant dense<0.000000e+00> : vector<128xf32>
    %63 = vector.multi_reduction <add>, %62, %cst_26 [0] : vector<32x128xf32> to vector<128xf32>
    %64 = vector.shape_cast %63 : vector<128xf32> to vector<1x128xf32>
    %65 = tpu.concatenate %61, %64 in 0 : vector<1x128xf32>, vector<1x128xf32> -> vector<2x128xf32>
    %cst_27 = arith.constant dense<0.000000e+00> : vector<2x128xf32>
    %66 = tpu.matmul %65, %1, %cst_27 {dimension_numbers = #tpu.dot_dimension_numbers<[1], [0], [0], [1], [0, 0, 1, 1], [], []>} : vector<2x128xf32>, vector<128x128xf32>, vector<2x128xf32> -> vector<2x128xf32>
    %cst_28 = arith.constant 0.001953125 : f32
    %67 = vector.broadcast %cst_28 : f32 to vector<2x128xf32>
    %68 = arith.mulf %66, %67 : vector<2x128xf32>
    %69 = vector.extract_strided_slice %68 {offsets = [0, 0], sizes = [1, 128], strides = [1, 1]} : vector<2x128xf32> to vector<1x128xf32>
    %70 = vector.extract_strided_slice %68 {offsets = [1, 0], sizes = [1, 128], strides = [1, 1]} : vector<2x128xf32> to vector<1x128xf32>
    %71 = arith.mulf %69, %69 : vector<1x128xf32>
    %72 = arith.subf %70, %71 : vector<1x128xf32>
    %c0_29 = arith.constant 0 : index
    %c0_30 = arith.constant 0 : index
    %73 = vector.load %arg5[%c0_29, %c0_30] : memref<1x128xf32, #tpu.memory_space<vmem>>, vector<1x128xf32>
    %cst_31 = arith.constant 9.99999974E-6 : f32
    %74 = vector.broadcast %cst_31 : f32 to vector<1x128xf32>
    %75 = arith.addf %72, %74 : vector<1x128xf32>
    %76 = math.rsqrt %75 : vector<1x128xf32>
    %77 = arith.mulf %73, %76 : vector<1x128xf32>
    %c0_32 = arith.constant 0 : index
    %c0_33 = arith.constant 0 : index
    %78 = vector.load %arg6[%c0_32, %c0_33] : memref<1x128xf32, #tpu.memory_space<vmem>>, vector<1x128xf32>
    %79 = arith.mulf %69, %77 : vector<1x128xf32>
    %80 = arith.subf %78, %79 : vector<1x128xf32>
    %81 = vector.broadcast %77 : vector<1x128xf32> to vector<32x128xf32>
    %82 = arith.mulf %59, %81 : vector<32x128xf32>
    %83 = vector.broadcast %80 : vector<1x128xf32> to vector<32x128xf32>
    %84 = arith.addf %82, %83 : vector<32x128xf32>
    %cst_34 = arith.constant 0.000000e+00 : f32
    %85 = vector.broadcast %cst_34 : f32 to vector<32x128xf32>
    %86 = arith.maximumf %84, %85 : vector<32x128xf32>
    %c1_i32_35 = arith.constant 1 : i32
    %87 = tpu.dynamic_rotate %86 by %c1_i32_35 dim 0 : vector<32x128xf32>, i32 -> vector<32x128xf32>
    %cst_36 = arith.constant 0.000000e+00 : f32
    %88 = vector.broadcast %cst_36 : f32 to vector<32x128xf32>
    %89 = arith.select %20, %87, %88 : vector<32x128xi1>, vector<32x128xf32>
    %c31_i32_37 = arith.constant 31 : i32
    %90 = tpu.dynamic_rotate %86 by %c31_i32_37 dim 0 : vector<32x128xf32>, i32 -> vector<32x128xf32>
    %cst_38 = arith.constant 0.000000e+00 : f32
    %91 = vector.broadcast %cst_38 : f32 to vector<32x128xf32>
    %92 = arith.select %38, %90, %91 : vector<32x128xi1>, vector<32x128xf32>
    %93 = arith.truncf %89 : vector<32x128xf32> to vector<32x128xbf16>
    %c0_39 = arith.constant 0 : index
    %c0_40 = arith.constant 0 : index
    %c0_41 = arith.constant 0 : index
    %94 = vector.load %arg3[%c0_39, %c0_40, %c0_41] : memref<3x128x128xbf16, #tpu.memory_space<vmem>>, vector<1x128x128xbf16>
    %95 = vector.shape_cast %94 : vector<1x128x128xbf16> to vector<128x128xbf16>
    %cst_42 = arith.constant dense<0.000000e+00> : vector<32x128xf32>
    %96 = tpu.matmul %93, %95, %cst_42 {dimension_numbers = #tpu.dot_dimension_numbers<[1], [0], [0], [1], [0, 0, 1, 1], [], []>} : vector<32x128xbf16>, vector<128x128xbf16>, vector<32x128xf32> -> vector<32x128xf32>
    %97 = arith.truncf %86 : vector<32x128xf32> to vector<32x128xbf16>
    %c1_43 = arith.constant 1 : index
    %c0_44 = arith.constant 0 : index
    %c0_45 = arith.constant 0 : index
    %98 = vector.load %arg3[%c1_43, %c0_44, %c0_45] : memref<3x128x128xbf16, #tpu.memory_space<vmem>>, vector<1x128x128xbf16>
    %99 = vector.shape_cast %98 : vector<1x128x128xbf16> to vector<128x128xbf16>
    %cst_46 = arith.constant dense<0.000000e+00> : vector<32x128xf32>
    %100 = tpu.matmul %97, %99, %cst_46 {dimension_numbers = #tpu.dot_dimension_numbers<[1], [0], [0], [1], [0, 0, 1, 1], [], []>} : vector<32x128xbf16>, vector<128x128xbf16>, vector<32x128xf32> -> vector<32x128xf32>
    %101 = arith.addf %96, %100 : vector<32x128xf32>
    %102 = arith.truncf %92 : vector<32x128xf32> to vector<32x128xbf16>
    %c2_47 = arith.constant 2 : index
    %c0_48 = arith.constant 0 : index
    %c0_49 = arith.constant 0 : index
    %103 = vector.load %arg3[%c2_47, %c0_48, %c0_49] : memref<3x128x128xbf16, #tpu.memory_space<vmem>>, vector<1x128x128xbf16>
    %104 = vector.shape_cast %103 : vector<1x128x128xbf16> to vector<128x128xbf16>
    %cst_50 = arith.constant dense<0.000000e+00> : vector<32x128xf32>
    %105 = tpu.matmul %102, %104, %cst_50 {dimension_numbers = #tpu.dot_dimension_numbers<[1], [0], [0], [1], [0, 0, 1, 1], [], []>} : vector<32x128xbf16>, vector<128x128xbf16>, vector<32x128xf32> -> vector<32x128xf32>
    %106 = arith.addf %101, %105 : vector<32x128xf32>
    %cst_51 = arith.constant dense<0.000000e+00> : vector<128xf32>
    %107 = vector.multi_reduction <add>, %106, %cst_51 [0] : vector<32x128xf32> to vector<128xf32>
    %108 = vector.shape_cast %107 : vector<128xf32> to vector<1x128xf32>
    %109 = arith.mulf %106, %106 : vector<32x128xf32>
    %cst_52 = arith.constant dense<0.000000e+00> : vector<128xf32>
    %110 = vector.multi_reduction <add>, %109, %cst_52 [0] : vector<32x128xf32> to vector<128xf32>
    %111 = vector.shape_cast %110 : vector<128xf32> to vector<1x128xf32>
    %112 = tpu.concatenate %108, %111 in 0 : vector<1x128xf32>, vector<1x128xf32> -> vector<2x128xf32>
    %cst_53 = arith.constant dense<0.000000e+00> : vector<2x128xf32>
    %113 = tpu.matmul %112, %1, %cst_53 {dimension_numbers = #tpu.dot_dimension_numbers<[1], [0], [0], [1], [0, 0, 1, 1], [], []>} : vector<2x128xf32>, vector<128x128xf32>, vector<2x128xf32> -> vector<2x128xf32>
    %cst_54 = arith.constant 0.001953125 : f32
    %114 = vector.broadcast %cst_54 : f32 to vector<2x128xf32>
    %115 = arith.mulf %113, %114 : vector<2x128xf32>
    %116 = vector.extract_strided_slice %115 {offsets = [0, 0], sizes = [1, 128], strides = [1, 1]} : vector<2x128xf32> to vector<1x128xf32>
    %117 = vector.extract_strided_slice %115 {offsets = [1, 0], sizes = [1, 128], strides = [1, 1]} : vector<2x128xf32> to vector<1x128xf32>
    %118 = arith.mulf %116, %116 : vector<1x128xf32>
    %119 = arith.subf %117, %118 : vector<1x128xf32>
    %c0_55 = arith.constant 0 : index
    %c0_56 = arith.constant 0 : index
    %120 = vector.load %arg7[%c0_55, %c0_56] : memref<1x128xf32, #tpu.memory_space<vmem>>, vector<1x128xf32>
    %cst_57 = arith.constant 9.99999974E-6 : f32
    %121 = vector.broadcast %cst_57 : f32 to vector<1x128xf32>
    %122 = arith.addf %119, %121 : vector<1x128xf32>
    %123 = math.rsqrt %122 : vector<1x128xf32>
    %124 = arith.mulf %120, %123 : vector<1x128xf32>
    %c0_58 = arith.constant 0 : index
    %c0_59 = arith.constant 0 : index
    %125 = vector.load %arg8[%c0_58, %c0_59] : memref<1x128xf32, #tpu.memory_space<vmem>>, vector<1x128xf32>
    %126 = arith.mulf %116, %124 : vector<1x128xf32>
    %127 = arith.subf %125, %126 : vector<1x128xf32>
    %128 = vector.broadcast %124 : vector<1x128xf32> to vector<32x128xf32>
    %129 = arith.mulf %106, %128 : vector<32x128xf32>
    %130 = vector.broadcast %127 : vector<1x128xf32> to vector<32x128xf32>
    %131 = arith.addf %129, %130 : vector<32x128xf32>
    %cst_60 = arith.constant 0.000000e+00 : f32
    %132 = vector.broadcast %cst_60 : f32 to vector<32x128xf32>
    %133 = arith.maximumf %131, %132 : vector<32x128xf32>
    %134 = arith.addf %133, %39 : vector<32x128xf32>
    %cst_61 = arith.constant 0.000000e+00 : f32
    %135 = vector.broadcast %cst_61 : f32 to vector<32x128xf32>
    %136 = arith.maximumf %134, %135 : vector<32x128xf32>
    %c0_62 = arith.constant 0 : index
    %c0_63 = arith.constant 0 : index
    %137 = vector.load %arg9[%c0_62, %c0_63] : memref<32x128xf32, #tpu.memory_space<vmem>>, vector<32x128xf32>
    tpu.vector_store %arg9[%c0_62, %c0_63], %136 {strides = array<i32>} : memref<32x128xf32, #tpu.memory_space<vmem>>, vector<32x128xf32>,
    return
  }
  func.func @transform_0(%arg0: i32) -> (i32, i32) {
    %c0_i32 = arith.constant 0 : i32
    %c0_i32_0 = arith.constant 0 : i32
    %c0_i32_1 = arith.constant 0 : i32
    return %c0_i32, %c0_i32_0 : i32, i32
  }
  func.func @transform_1(%arg0: i32) -> (i32, i32, i32) {
    %c0_i32 = arith.constant 0 : i32
    %c0_i32_0 = arith.constant 0 : i32
    %c0_i32_1 = arith.constant 0 : i32
    %c0_i32_2 = arith.constant 0 : i32
    return %c0_i32, %c0_i32_0, %c0_i32_1 : i32, i32, i32
  }
  func.func @transform_2(%arg0: i32) -> (i32, i32, i32) {
    %c0_i32 = arith.constant 0 : i32
    %c0_i32_0 = arith.constant 0 : i32
    %c0_i32_1 = arith.constant 0 : i32
    %c0_i32_2 = arith.constant 0 : i32
    return %c0_i32, %c0_i32_0, %c0_i32_1 : i32, i32, i32
  }
  func.func @transform_3(%arg0: i32) -> (i32, i32) {
    %c0_i32 = arith.constant 0 : i32
    %c0_i32_0 = arith.constant 0 : i32
    %c0_i32_1 = arith.constant 0 : i32
    return %c0_i32, %c0_i32_0 : i32, i32
  }
  func.func @transform_4(%arg0: i32) -> (i32, i32) {
    %c0_i32 = arith.constant 0 : i32
    %c0_i32_0 = arith.constant 0 : i32
    %c0_i32_1 = arith.constant 0 : i32
    return %c0_i32, %c0_i32_0 : i32, i32
  }
  func.func @transform_5(%arg0: i32) -> (i32, i32) {
    %c0_i32 = arith.constant 0 : i32
    %c0_i32_0 = arith.constant 0 : i32
    %c0_i32_1 = arith.constant 0 : i32
    return %c0_i32, %c0_i32_0 : i32, i32
  }
  func.func @transform_6(%arg0: i32) -> (i32, i32) {
    %c0_i32 = arith.constant 0 : i32
    %c0_i32_0 = arith.constant 0 : i32
    %c0_i32_1 = arith.constant 0 : i32
    return %c0_i32, %c0_i32_0 : i32, i32
  }
  func.func @transform_7(%arg0: i32) -> (i32, i32) {
    %c0_i32 = arith.constant 0 : i32
    %c0_i32_0 = arith.constant 0 : i32
    %c0_i32_1 = arith.constant 0 : i32
    return %c0_i32, %c0_i32_0 : i32, i32
  }
  func.func @transform_8(%arg0: i32) -> (i32, i32) {
    %c0_i32 = arith.constant 0 : i32
    %c0_i32_0 = arith.constant 0 : i32
    %c0_i32_1 = arith.constant 0 : i32
    return %c0_i32, %c0_i32_0 : i32, i32
  }
}

</mosaic_0001>

<bundles_post_ra>
// kernel: tile.23
= control target key start
LH: loop header
LB: loop body
LE: loop exit
PB: predicated region body
PF: predicated region fallthrough
CT: control target
= control target key end

     0   :  { %s28_s0 = inlined_call_operand.vmem [shape: f32[8], index: 0, kind: input, shape index: {}]   ;;  %s29_s1 = inlined_call_operand.vmem [shape: f32[16,8], index: 1, kind: output, shape index: {}]  }
   0x1   :  { %v4_v0 = vld [vmem:[%s28_s0] ss:$0 sm:$0xff] }
   0x2   :  { %5 = vst [vmem:[%s29_s1] sm:$0xff] %v4_v0  ;;  %8 = vst [vmem:[%s29_s1 + $0x8] sm:$0xff] %v4_v0 }

// kernel: tile.24
= control target key start
LH: loop header
LB: loop body
LE: loop exit
PB: predicated region body
PF: predicated region fallthrough
CT: control target
= control target key end

     0   :  { %s131_s10 = smov 120   ;;  %s132_s11 = smov 104   ;;  %vm3_vm0 = vcmask 64512   ;;  %vm9_vm1 = vcmask 1048512   ;;  %vm15_vm2 = vcmask 982912   ;;  %vm21_vm3 = vcmask 917312   ;;  %s207_s0 = inlined_call_operand.vmem [shape: f32[16,8], index: 0, kind: input, shape index: {}]   ;;  %s208_s1 = inlined_call_operand.vmem [shape: f32[1,128], index: 1, kind: output, shape index: {}]  }
   0x1   :  { %v101_v0 = vld [vmem:[%s207_s0 + $0xf] sm:$0x1]   ;;  %v103_v1 = vld [vmem:[%s207_s0 + $0xd] sm:$0x1]   ;;  %v102_v2 = vld [vmem:[%s207_s0 + $0xe] sm:$0x1]  }
   0x2   :  { %7 = vrot.lane.b32.xlu0 %v101_v0, %s131_s10  ;;  %19 = vrot.lane.b32.xlu1 %v103_v1, %s132_s11  ;;  %v104_v3 = vld [vmem:[%s207_s0 + $0xc] sm:$0x1]   ;;  %s133_s16 = smov 112   ;;  %s134_s17 = smov 96   ;;  %v105_v4 = vld [vmem:[%s207_s0 + $0xb] sm:$0x1]  }
   0x3   :  { %v106_v5 = vld [vmem:[%s207_s0 + $0xa] sm:$0x1]   ;;  %v2_v6 = vld [vmem:[%s207_s0] sm:$0x1]   ;;  %s135_s24 = smov 88   ;;  %s136_s25 = smov 80  }
   0x4   :  { %4 = vst.msk [vmem:[#allocation0] sm:$0x1] %vm3_vm0, %v2_v6   ;;  %v107_v7 = vld [vmem:[%s207_s0 + $0x9] sm:$0x1]   ;;  %v108_v8 = vld [vmem:[%s207_s0 + $0x8] sm:$0x1]  }
   0x5   :  { %s137_s30 = smov 72   ;;  %s138_s2 = smov 64   ;;  %v109_v9 = vld [vmem:[%s207_s0 + $0x7] sm:$0x1]   ;;  %v110_v10 = vld [vmem:[%s207_s0 + $0x6] sm:$0x1]  }
   0x6   :  { %13 = vrot.lane.b32.xlu0 %v102_v2, %s133_s16  ;;  %25 = vrot.lane.b32.xlu1 %v104_v3, %s134_s17  ;;  %s139_s7 = smov 56   ;;  %s140_s8 = smov 48   ;;  %v111_v11 = vld [vmem:[%s207_s0 + $0x5] sm:$0x1]   ;;  %v112_v12 = vld [vmem:[%s207_s0 + $0x4] sm:$0x1]  }
   0x7   :  { %s141_s13 = smov 40   ;;  %s142_s14 = smov 32   ;;  %v113_v13 = vld [vmem:[%s207_s0 + $0x3] sm:$0x1]   ;;  %v114_v14 = vld [vmem:[%s207_s0 + $0x2] sm:$0x1]  }
   0x8   :  { %s143_s19 = smov 24   ;;  %s144_s20 = smov 16   ;;  %v115_v15 = vld [vmem:[%s207_s0 + $0x1] sm:$0x1]   ;;  %vm27_vm4 = vcmask 851712   ;;  %vm33_vm5 = vcmask 786112  }
   0x9   :  { %s145_s0 = smov 8   ;;  %vm39_vm6 = vcmask 720512   ;;  %vm45_vm7 = vcmask 654912   ;;  %vm51_vm8 = vcmask 589312   ;;  %vm57_vm9 = vcmask 523712  }
   0xa   :  { %31 = vrot.lane.b32.xlu0 %v105_v4, %s135_s24  ;;  %37 = vrot.lane.b32.xlu1 %v106_v5, %s136_s25  ;;  %vm63_vm10 = vcmask 458112   ;;  %vm69_vm11 = vcmask 392512   ;;  %vm75_vm12 = vcmask 326912   ;;  %vm81_vm13 = vcmask 261312  }
   0xb   :  { %vm87_vm14 = vcmask 195712   ;;  %vm93_vm15 = vcmask 130112  }
   0xe   :  { %43 = vrot.lane.b32.xlu0 %v107_v7, %s137_s30  ;;  %49 = vrot.lane.b32.xlu1 %v108_v8, %s138_s2 }
  0x12   :  { %55 = vrot.lane.b32.xlu0 %v109_v9, %s139_s7  ;;  %61 = vrot.lane.b32.xlu1 %v110_v10, %s140_s8 }
  0x16   :  { %67 = vrot.lane.b32.xlu0 %v111_v11, %s141_s13  ;;  %73 = vrot.lane.b32.xlu1 %v112_v12, %s142_s14 }
  0x1a   :  { %79 = vrot.lane.b32.xlu0 %v113_v13, %s143_s19  ;;  %85 = vrot.lane.b32.xlu1 %v114_v14, %s144_s20 }
  0x1e   :  { %91 = vrot.lane.b32.xlu0 %v115_v15, %s145_s0 }
  0x74   :  { %v8_v16 = vpop.permute.xlu0 %7   ;;  %v20_v17 = vpop.permute.xlu1 %19  }
  0x75   :  { %10 = vst.msk [vmem:[#allocation0] sm:$0x1] %vm9_vm1, %v8_v16  }
  0x78   :  { %v14_v18 = vpop.permute.xlu0 %13   ;;  %v26_v19 = vpop.permute.xlu1 %25  }
  0x79   :  { %16 = vst.msk [vmem:[#allocation0] sm:$0x1] %vm15_vm2, %v14_v18  }
  0x7a   :  { %22 = vst.msk [vmem:[#allocation0] sm:$0x1] %vm21_vm3, %v20_v17  }
  0x7b   :  { %28 = vst.msk [vmem:[#allocation0] sm:$0x1] %vm27_vm4, %v26_v19  }
  0x7c   :  { %v32_v20 = vpop.permute.xlu0 %31   ;;  %v38_v21 = vpop.permute.xlu1 %37  }
  0x7d   :  { %34 = vst.msk [vmem:[#allocation0] sm:$0x1] %vm33_vm5, %v32_v20  }
  0x7e   :  { %40 = vst.msk [vmem:[#allocation0] sm:$0x1] %vm39_vm6, %v38_v21  }
  0x80   :  { %v44_v22 = vpop.permute.xlu0 %43   ;;  %v50_v23 = vpop.permute.xlu1 %49  }
  0x81   :  { %46 = vst.msk [vmem:[#allocation0] sm:$0x1] %vm45_vm7, %v44_v22  }
  0x82   :  { %52 = vst.msk [vmem:[#allocation0] sm:$0x1] %vm51_vm8, %v50_v23  }
  0x84   :  { %v56_v24 = vpop.permute.xlu0 %55   ;;  %v62_v25 = vpop.permute.xlu1 %61  }
  0x85   :  { %58 = vst.msk [vmem:[#allocation0] sm:$0x1] %vm57_vm9, %v56_v24  }
  0x86   :  { %64 = vst.msk [vmem:[#allocation0] sm:$0x1] %vm63_vm10, %v62_v25  }
  0x88   :  { %v68_v26 = vpop.permute.xlu0 %67   ;;  %v74_v27 = vpop.permute.xlu1 %73  }
  0x89   :  { %70 = vst.msk [vmem:[#allocation0] sm:$0x1] %vm69_vm11, %v68_v26  }
  0x8a   :  { %76 = vst.msk [vmem:[#allocation0] sm:$0x1] %vm75_vm12, %v74_v27  }
  0x8c   :  { %v80_v28 = vpop.permute.xlu0 %79   ;;  %v86_v29 = vpop.permute.xlu1 %85  }
  0x8d   :  { %82 = vst.msk [vmem:[#allocation0] sm:$0x1] %vm81_vm13, %v80_v28  }
  0x8e   :  { %88 = vst.msk [vmem:[#allocation0] sm:$0x1] %vm87_vm14, %v86_v29  }
  0x90   :  { %v92_v30 = vpop.permute.xlu0 %91  }
  0x91   :  { %94 = vst.msk [vmem:[#allocation0] sm:$0x1] %vm93_vm15, %v92_v30  }
  0x98   :  { %v98_v31 = vld [vmem:[#allocation0] sm:$0x1] }
  0x99   :  { %100 = vst [vmem:[%s208_s1] sm:$0x1] %v98_v31 }

// kernel: basic_block_forward.1
= control target key start
LH: loop header
LB: loop body
LE: loop exit
PB: predicated region body
PF: predicated region fallthrough
CT: control target
= control target key end

     0   :  { %v1770_v1 = vmov 0.0|0.0   ;;  %v62_v10 = vlaneseq  ;;  %vm1771_vm2 = vmmov 1   ;;  %vm1772_vm11 = vmmov 0   ;;  %s2188_s1 = inlined_call_operand.vmem [shape: bf16[3,128,128], index: 1, kind: input, shape index: {}]   ;;  %s2189_s0 = inlined_call_operand.vmem [shape: f32[32,128], index: 0, kind: input, shape index: {}]   ;;  %s2190_s3 = inlined_call_operand.vmem [shape: bf16[128,128], index: 3, kind: input, shape index: {}]   ;;  %s2191_s2 = inlined_call_operand.vmem [shape: bf16[3,128,128], index: 2, kind: input, shape index: {}]   ;;  %s2192_s4 = inlined_call_operand.vmem [shape: f32[1,128], index: 4, kind: input, shape index: {}]   ;;  %s2193_s5 = inlined_call_operand.vmem [shape: f32[1,128], index: 5, kind: input, shape index: {}]   ;;  %s2194_s6 = inlined_call_operand.vmem [shape: f32[1,128], index: 6, kind: input, shape index: {}]   ;;  %s2195_s7 = inlined_call_operand.vmem [shape: f32[1,128], index: 7, kind: input, shape index: {}]   ;;  %s2196_s8 = inlined_call_operand.vmem [shape: f32[32,128], index: 8, kind: output, shape index: {}]  }
   0x1   :  { %v1718_v0 = vld [vmem:[%s2188_s1 + $0x40] sm:$0xff]   ;;  %1649 = vmatprep.subr.bf16.mxu1 %v1770_v1  ;;  %v1719_v2 = vld [vmem:[%s2188_s1 + $0x48] sm:$0xff]   ;;  %v1720_v3 = vld [vmem:[%s2188_s1 + $0x50] sm:$0xff]   ;;  %vm526_vm12 = vcmask 1040384  }
   0x2   :  { %1459 = vmatprep.subr.bf16.mxu0 %v1718_v0  ;;  %v1721_v4 = vld [vmem:[%s2188_s1 + $0x58] sm:$0xff]   ;;  %v1836_v5 = vld [vmem:[%s2189_s0] sm:$0xff]  ;;  %v1841_v6 = vld [vmem:[%s2189_s0 + $0x8] sm:$0xff]  ;;  %v1854_v12 = vshrl.u32 %v62_v10, 7 }
   0x3   :  { %1460 = vmatpush3.bf16.msra.mxu0 %v1718_v0  ;;  %v171_v7 = vpack.c.bf16 %v1841_v6, %v1836_v5  ;;  %v1722_v8 = vld [vmem:[%s2188_s1 + $0x60] sm:$0xff]   ;;  %v1723_v9 = vld [vmem:[%s2188_s1 + $0x68] sm:$0xff]   ;;  %v1724_v11 = vld [vmem:[%s2188_s1 + $0x70] sm:$0xff]   ;;  %v127_v14 = vrot.slane %v1836_v5, 7  ;;  %v128_v16 = vrot.slane %v1841_v6, 7  ;;  %v140_v37 = vrot.slane %v1836_v5, 1 }
   0x4   :  { %1461 = vmatprep.subr.bf16.mxu0 %v1719_v2  ;;  %v1725_v13 = vld [vmem:[%s2188_s1 + $0x78] sm:$0xff]   ;;  %v71_v18 = vand.u32 15, %v1854_v12  ;;  %vm131_vm0 = vcmp.lt.s32.totalorder %v1854_v12, 1  ;;  %v1872_v19 = vld [vmem:[%s2189_s0 + $0x10] sm:$0xff]  ;;  %v1877_v20 = vld [vmem:[%s2190_s3] sm:$0xff]   ;;  %v65_v34 = vadd.s32 16, %v1854_v12 }
   0x5   :  { %1475 = vmatprep.mubr.bf16.mxu0 %v171_v7  ;;  %v1863_v15 = vld [vmem:[%s2189_s0 + $0x18] sm:$0xff]  ;;  %v1726_v21 = vld [vmem:[%s2188_s1] sm:$0xff]   ;;  %v134_v22 = vsel %vm131_vm0, %v127_v14, %v128_v16  ;;  %1651 = vmatpush3.bf16.msra.mxu1 %v1877_v20  ;;  %v1891_v24 = vld [vmem:[%s2190_s3 + $0x8] sm:$0xff]   ;;  %v64_v35 = vadd.s32 8, %v1854_v12  ;;  %v129_v36 = vrot.slane %v1872_v19, 7  ;;  %v141_v38 = vrot.slane %v1841_v6, 1 }
   0x6   :  { %v130_v17 = vrot.slane %v1863_v15, 7  ;;  %vm115_vm1 = vcmp.ne.s32.totalorder %v71_v18, 0  ;;  %1652 = vmatprep.subr.bf16.mxu1 %v1770_v1  ;;  %v172_v25 = vpack.c.bf16 %v1863_v15, %v1872_v19  ;;  %v1727_v27 = vld [vmem:[%s2188_s1 + $0x8] sm:$0xff]   ;;  %v1728_v29 = vld [vmem:[%s2188_s1 + $0x10] sm:$0xff]   ;;  %v1729_v30 = vld [vmem:[%s2188_s1 + $0x18] sm:$0xff]   ;;  %v142_v39 = vrot.slane %v1872_v19, 1 }
   0x7   :  { %1462 = vmatpush3.bf16.msra.mxu0 %v1719_v2  ;;  %vm1899_vm3 = vmpackc.low %vm1771_vm2, %vm115_vm1  ;;  %v1730_v31 = vld [vmem:[%s2188_s1 + $0x20] sm:$0xff]   ;;  %v1731_v32 = vld [vmem:[%s2188_s1 + $0x28] sm:$0xff]   ;;  %v85_v41 = vand.u32 15, %v65_v34  ;;  %v78_v42 = vand.u32 15, %v64_v35  ;;  %vm144_vm4 = vcmp.lt.s32.totalorder %v1854_v12, 7  ;;  %v133_v44 = vsel %vm131_vm0, %v128_v16, %v129_v36 }
   0x8   :  { %1463 = vmatprep.subr.bf16.mxu0 %v1720_v3  ;;  %v135_v23 = vsel %vm131_vm0, %v130_v17, %v127_v14  ;;  %v1732_v33 = vld [vmem:[%s2188_s1 + $0x30] sm:$0xff]   ;;  %v1733_v40 = vld [vmem:[%s2188_s1 + $0x38] sm:$0xff]   ;;  %v132_v43 = vsel %vm131_vm0, %v129_v36, %v130_v17  ;;  %v1734_v45 = vld [vmem:[%s2188_s1 + $0x80] sm:$0xff]   ;;  %v146_v46 = vsel %vm144_vm4, %v141_v38, %v142_v39  ;;  %v147_v47 = vsel %vm144_vm4, %v140_v37, %v141_v38 }
   0x9   :  { %v1223_v26 = vpack.c.bf16 %v134_v22, %v135_v23  ;;  %1654 = vmatpush3.bf16.msra.mxu1 %v1891_v24  ;;  %vm117_vm5 = vcmp.ne.s32.totalorder %v85_v41, 0  ;;  %vm120_vm6 = vcmp.ne.s32.totalorder %v78_v42, 15  ;;  %v1226_v48 = vpack.c.bf16 %v132_v43, %v133_v44  ;;  %v1735_v51 = vld [vmem:[%s2188_s1 + $0x88] sm:$0xff]   ;;  %v1736_v53 = vld [vmem:[%s2188_s1 + $0x90] sm:$0xff]   ;;  %v1737_v54 = vld [vmem:[%s2188_s1 + $0x98] sm:$0xff]  }
   0xa   :  { %1655 = vmatprep.subr.bf16.mxu1 %v1770_v1  ;;  %vm1944_vm7 = vmpackc.low %vm1771_vm2, %vm117_vm5  ;;  %v1253_v50 = vpack.c.bf16 %v146_v46, %v147_v47  ;;  %v1738_v55 = vld [vmem:[%s2188_s1 + $0xa0] sm:$0xff]   ;;  %v1739_v56 = vld [vmem:[%s2188_s1 + $0xa8] sm:$0xff]   ;;  %v66_v58 = vadd.s32 24, %v1854_v12  ;;  %v143_v59 = vrot.slane %v1863_v15, 1 }
   0xb   :  { %1464 = vmatpush3.bf16.msra.mxu0 %v1720_v3  ;;  %vm1952_vm8 = vmpackc.low %vm120_vm6, %vm1771_vm2  ;;  %v1740_v57 = vld [vmem:[%s2188_s1 + $0xb0] sm:$0xff]   ;;  %v1741_v60 = vld [vmem:[%s2188_s1 + $0xb8] sm:$0xff]  }
   0xc   :  { %1465 = vmatprep.subr.bf16.mxu0 %v1721_v4  ;;  %v92_v61 = vand.u32 15, %v66_v58  ;;  %v145_v62 = vsel %vm144_vm4, %v142_v39, %v143_v59  ;;  %v148_v63 = vsel %vm144_vm4, %v143_v59, %v140_v37  ;;  %v1359_v3 = vld [vmem:[%s2190_s3 + $0x10] sm:$0xff]   ;;  %v1361_v7 = vld [vmem:[%s2190_s3 + $0x20] sm:$0xff]   ;;  %v1743_v43 = vld [vmem:[%s2191_s2 + $0x48] sm:$0xff]  }
   0xd   :  { %v1256_v0 = vpack.c.bf16 %v148_v63, %v145_v62  ;;  %1657 = vmatpush3.bf16.msra.mxu1 %v1359_v3  ;;  %v1363_v10 = vld [vmem:[%s2190_s3 + $0x30] sm:$0xff]   ;;  %v1742_v42 = vld [vmem:[%s2191_s2 + $0x40] sm:$0xff]   ;;  %v1747_v47 = vld [vmem:[%s2191_s2 + $0x68] sm:$0xff]  }
   0xe   :  { %vm122_vm9 = vcmp.ne.s32.totalorder %v92_v61, 15  ;;  %1658 = vmatprep.subr.bf16.mxu1 %v1770_v1  ;;  %v1744_v44 = vld [vmem:[%s2191_s2 + $0x50] sm:$0xff]   ;;  %v1746_v46 = vld [vmem:[%s2191_s2 + $0x60] sm:$0xff]   ;;  %v1763_v52 = vld [vmem:[%s2191_s2 + $0xa8] sm:$0xff]  }
   0xf   :  { %1466 = vmatpush3.bf16.msra.mxu0 %v1721_v4  ;;  %vm1985_vm10 = vmpackc.low %vm122_vm9, %vm1771_vm2  ;;  %v1360_v4 = vld [vmem:[%s2190_s3 + $0x18] sm:$0xff]   ;;  %v1756_v28 = vld [vmem:[%s2191_s2 + $0x30] sm:$0xff]  }
  0x10   :  { %1467 = vmatprep.subr.bf16.mxu0 %v1722_v8  ;;  %v1762_v49 = vld [vmem:[%s2191_s2 + $0xa0] sm:$0xff]  }
  0x11   :  { %1660 = vmatpush3.bf16.msra.mxu1 %v1360_v4 }
  0x12   :  { %1661 = vmatprep.subr.bf16.mxu1 %v1770_v1 }
  0x13   :  { %1468 = vmatpush3.bf16.msra.mxu0 %v1722_v8  ;;  %v1362_v8 = vld [vmem:[%s2190_s3 + $0x28] sm:$0xff]  }
  0x14   :  { %1469 = vmatprep.subr.bf16.mxu0 %v1723_v9 }
  0x15   :  { %1663 = vmatpush3.bf16.msra.mxu1 %v1361_v7 }
  0x16   :  { %1664 = vmatprep.subr.bf16.mxu1 %v1770_v1 }
  0x17   :  { %1470 = vmatpush3.bf16.msra.mxu0 %v1723_v9  ;;  %v1773_v9 = vmov 0.0  }
  0x18   :  { %1471 = vmatprep.subr.bf16.mxu0 %v1724_v11  ;;  %1551 = vmatprep.mubr.msk.f32.mxu1 %vm1772_vm11, %v1773_v9 }
  0x19   :  { %1666 = vmatpush3.bf16.msra.mxu1 %v1362_v8 }
  0x1a   :  { %1667 = vmatprep.subr.bf16.mxu1 %v1770_v1 }
  0x1b   :  { %1472 = vmatpush3.bf16.msra.mxu0 %v1724_v11  ;;  %v1364_v11 = vld [vmem:[%s2190_s3 + $0x38] sm:$0xff]  }
  0x1c   :  { %1473 = vmatprep.subr.bf16.mxu0 %v1725_v13 }
  0x1d   :  { %1669 = vmatpush3.bf16.msra.mxu1 %v1363_v10 }
  0x1e   :  { %1670 = vmatprep.subr.bf16.mxu1 %v1770_v1 }
  0x1f   :  { %1474 = vmatpush3.bf16.msra.mxu0 %v1725_v13 }
  0x20   :  { %1479 = vmatprep.subr.bf16.mxu0 %v1726_v21 }
  0x21   :  { %1672 = vmatpush3.bf16.msra.mxu1 %v1364_v11 }
  0x22   :  { %1476 = vmatmul.mubr.bf16.vlgmr.msra.gmra.mrb[0].mxu0 %v172_v25  ;;  %1554 = vmatprep.subr.bf16.mxu1 %v1742_v42 }
  0x23   :  { %1480 = vmatpush3.bf16.msra.mxu0 %v1726_v21  ;;  %1495 = vmatprep.mubr.msk.bf16.mxu0 %vm1899_vm3, %v1223_v26 }
  0x24   :  { %1481 = vmatprep.subr.bf16.mxu0 %v1727_v27 }
  0x27   :  { %1482 = vmatpush3.bf16.msra.mxu0 %v1727_v27 }
  0x28   :  { %1483 = vmatprep.subr.bf16.mxu0 %v1728_v29 }
  0x2b   :  { %1484 = vmatpush3.bf16.msra.mxu0 %v1728_v29 }
  0x2c   :  { %1485 = vmatprep.subr.bf16.mxu0 %v1729_v30 }
  0x2f   :  { %1486 = vmatpush3.bf16.msra.mxu0 %v1729_v30 }
  0x30   :  { %1487 = vmatprep.subr.bf16.mxu0 %v1730_v31 }
  0x33   :  { %1488 = vmatpush3.bf16.msra.mxu0 %v1730_v31 }
  0x34   :  { %1489 = vmatprep.subr.bf16.mxu0 %v1731_v32 }
  0x37   :  { %1490 = vmatpush3.bf16.msra.mxu0 %v1731_v32 }
  0x38   :  { %1491 = vmatprep.subr.bf16.mxu0 %v1732_v33 }
  0x3b   :  { %1492 = vmatpush3.bf16.msra.mxu0 %v1732_v33 }
  0x3c   :  { %1493 = vmatprep.subr.bf16.mxu0 %v1733_v40 }
  0x3f   :  { %1494 = vmatpush3.bf16.msra.mxu0 %v1733_v40 }
  0x40   :  { %1499 = vmatprep.subr.bf16.mxu0 %v1734_v45 }
  0x42   :  { %1496 = vmatmul.mubr.msk.bf16.vlgmr.msra.gmra.mrb[0].mxu0 %vm1944_vm7, %v1226_v48  ;;  %v1748_v48 = vld [vmem:[%s2191_s2 + $0x70] sm:$0xff]  }
  0x43   :  { %1500 = vmatpush3.bf16.msra.mxu0 %v1734_v45  ;;  %1515 = vmatprep.mubr.msk.bf16.mxu0 %vm1952_vm8, %v1253_v50  ;;  %v1745_v45 = vld [vmem:[%s2191_s2 + $0x58] sm:$0xff]  }
  0x44   :  { %1501 = vmatprep.subr.bf16.mxu0 %v1735_v51  ;;  %v1749_v50 = vld [vmem:[%s2191_s2 + $0x78] sm:$0xff]  }
  0x47   :  { %1502 = vmatpush3.bf16.msra.mxu0 %v1735_v51  ;;  %v1750_v51 = vld [vmem:[%s2191_s2] sm:$0xff]  }
  0x48   :  { %1503 = vmatprep.subr.bf16.mxu0 %v1736_v53 }
  0x4b   :  { %1504 = vmatpush3.bf16.msra.mxu0 %v1736_v53 }
  0x4c   :  { %1505 = vmatprep.subr.bf16.mxu0 %v1737_v54 }
  0x4f   :  { %1506 = vmatpush3.bf16.msra.mxu0 %v1737_v54 }
  0x50   :  { %1507 = vmatprep.subr.bf16.mxu0 %v1738_v55 }
  0x53   :  { %1508 = vmatpush3.bf16.msra.mxu0 %v1738_v55 }
  0x54   :  { %1509 = vmatprep.subr.bf16.mxu0 %v1739_v56 }
  0x57   :  { %1510 = vmatpush3.bf16.msra.mxu0 %v1739_v56 }
  0x58   :  { %1511 = vmatprep.subr.bf16.mxu0 %v1740_v57 }
  0x5b   :  { %1512 = vmatpush3.bf16.msra.mxu0 %v1740_v57 }
  0x5c   :  { %1513 = vmatprep.subr.bf16.mxu0 %v1741_v60 }
  0x5f   :  { %1514 = vmatpush3.bf16.msra.mxu0 %v1741_v60  ;;  %v1774_v60 = vmov 1966171168  }
  0x60   :  { %1673 = vmatprep.subr.bf16.mxu0 %v1770_v1  ;;  %v609_v61 = vunpack.c.l.s4 %v1774_v60  ;;  %v1758_v60 = vld [vmem:[%s2191_s2 + $0x80] sm:$0xff]  }
  0x62   :  { %1516 = vmatmul.mubr.msk.bf16.vlgmr.msra.gmra.mrb[0].mxu0 %vm1985_vm10, %v1256_v0  ;;  %v610_v62 = vunpack.c.0.s8 %v609_v61  ;;  %v1759_v61 = vld [vmem:[%s2191_s2 + $0x88] sm:$0xff]  }
  0x63   :  { %1675 = vmatpush3.bf16.msra.mxu0 %v1877_v20  ;;  %1646 = vmatprep.mubr.msk.f32.mxu0 %vm1772_vm11, %v1773_v9  ;;  %v2081_v9 = vsub.s32 0, %v1854_v12 }
  0x64   :  { %1676 = vmatprep.subr.bf16.mxu0 %v1770_v1  ;;  %v2073_v63 = vsub.s32 %v610_v62, %v1854_v12  ;;  %v1755_v12 = vld [vmem:[%s2191_s2 + $0x28] sm:$0xff]   ;;  %v1760_v62 = vld [vmem:[%s2191_s2 + $0x90] sm:$0xff]  }
  0x67   :  { %1678 = vmatpush3.bf16.msra.mxu0 %v1891_v24 }
  0x68   :  { %1679 = vmatprep.subr.bf16.mxu0 %v1770_v1 }
  0x6b   :  { %1681 = vmatpush3.bf16.msra.mxu0 %v1359_v3 }
  0x6c   :  { %1682 = vmatprep.subr.bf16.mxu0 %v1770_v1 }
  0x6f   :  { %1684 = vmatpush3.bf16.msra.mxu0 %v1360_v4 }
  0x70   :  { %1685 = vmatprep.subr.bf16.mxu0 %v1770_v1 }
  0x73   :  { %1687 = vmatpush3.bf16.msra.mxu0 %v1361_v7  ;;  %v604_v7 = vld [vmem:[%s2192_s4] sm:$0x1] }
  0x74   :  { %1688 = vmatprep.subr.bf16.mxu0 %v1770_v1 }
  0x77   :  { %1690 = vmatpush3.bf16.msra.mxu0 %v1362_v8 }
  0x78   :  { %1691 = vmatprep.subr.bf16.mxu0 %v1770_v1 }
  0x7b   :  { %1693 = vmatpush3.bf16.msra.mxu0 %v1363_v10 }
  0x7c   :  { %1694 = vmatprep.subr.bf16.mxu0 %v1770_v1 }
  0x7f   :  { %1696 = vmatpush3.bf16.msra.mxu0 %v1364_v11  ;;  %v625_v11 = vld [vmem:[%s2193_s5] sm:$0x1] }
 0x135   :  { %v2024_v13 = vpop.f32.mrb[0].mxu0 }
 0x136   :  { %v2026_v14 = vpop.f32.mrb[1].mxu0  ;;  %v515_v1 = vmul.f32 %v2024_v13, %v2024_v13 }
 0x137   :  { %v2028_v16 = vpop.f32.mrb[2].mxu0  ;;  %v513_v18 = vmul.f32 %v2026_v14, %v2026_v14 }
 0x138   :  { %v2030_v17 = vpop.f32.mrb[3].mxu0  ;;  %v516_v24 = vmul.f32 %v2028_v16, %v2028_v16 }
 0x139   :  { %v504_v20 = vadd.f32 %v2030_v17, %v2026_v14  ;;  %v514_v21 = vmul.f32 %v2030_v17, %v2030_v17 }
 0x13b   :  { %v505_v22 = vadd.f32 %v2024_v13, %v504_v20  ;;  %v517_v23 = vadd.f32 %v514_v21, %v513_v18 }
 0x13d   :  { %v506_v25 = vadd.f32 %v2028_v16, %v505_v22  ;;  %v518_v26 = vadd.f32 %v517_v23, %v515_v1 }
 0x13f   :  { %v507_v27 = vrot.slane %v506_v25, 4  ;;  %v519_v29 = vadd.f32 %v518_v26, %v516_v24 }
 0x141   :  { %v508_v30 = vadd.f32 %v507_v27, %v506_v25  ;;  %v520_v31 = vrot.slane %v519_v29, 4 }
 0x143   :  { %v509_v32 = vrot.slane %v508_v30, 2  ;;  %v521_v33 = vadd.f32 %v520_v31, %v519_v29 }
 0x145   :  { %v510_v34 = vadd.f32 %v509_v32, %v508_v30  ;;  %v522_v35 = vrot.slane %v521_v33, 2 }
 0x147   :  { %v511_v36 = vrot.slane %v510_v34, 1  ;;  %v523_v37 = vadd.f32 %v522_v35, %v521_v33 }
 0x149   :  { %v524_v38 = vrot.slane %v523_v37, 1  ;;  %v512_v39 = vadd.f32 %v511_v36, %v510_v34 }
 0x14b   :  { %v525_v40 = vadd.f32 %v524_v38, %v523_v37 }
 0x14d   :  { %v527_v41 = vsel %vm526_vm12, %v512_v39, %v525_v40 }
 0x14e   :  { %1552 = vmatmul.mubr.f32.vlgmr.msra.gmra.mrb[0].mxu1 %v527_v41 }
 0x14f   :  { %1555 = vmatpush3.bf16.msra.mxu1 %v1742_v42 }
 0x150   :  { %1556 = vmatprep.subr.bf16.mxu1 %v1743_v43 }
 0x153   :  { %1557 = vmatpush3.bf16.msra.mxu1 %v1743_v43 }
 0x154   :  { %1558 = vmatprep.subr.bf16.mxu1 %v1744_v44 }
 0x157   :  { %1559 = vmatpush3.bf16.msra.mxu1 %v1744_v44 }
 0x158   :  { %1560 = vmatprep.subr.bf16.mxu1 %v1745_v45 }
 0x15b   :  { %1561 = vmatpush3.bf16.msra.mxu1 %v1745_v45 }
 0x15c   :  { %1562 = vmatprep.subr.bf16.mxu1 %v1746_v46 }
 0x15f   :  { %1563 = vmatpush3.bf16.msra.mxu1 %v1746_v46 }
 0x160   :  { %1564 = vmatprep.subr.bf16.mxu1 %v1747_v47 }
 0x163   :  { %1565 = vmatpush3.bf16.msra.mxu1 %v1747_v47 }
 0x164   :  { %1566 = vmatprep.subr.bf16.mxu1 %v1748_v48 }
 0x167   :  { %1567 = vmatpush3.bf16.msra.mxu1 %v1748_v48 }
 0x168   :  { %1568 = vmatprep.subr.bf16.mxu1 %v1749_v50 }
 0x16b   :  { %1569 = vmatpush3.bf16.msra.mxu1 %v1749_v50 }
 0x16c   :  { %1574 = vmatprep.subr.bf16.mxu1 %v1750_v51 }
 0x221   :  { %v594_v53 = vpop.f32.mrb[0].mxu1 }
 0x222   :  { %v598_v54 = vmul.f32 0.001953125, %v594_v53  ;;  %v1553_v55 = vpop.f32.mrb[1].mxu1  ;;  %v1752_v53 = vld [vmem:[%s2191_s2 + $0x10] sm:$0xff]  }
 0x224   :  { %v599_v56 = vmul.f32 %v598_v54, %v598_v54 }
 0x226   :  { %v601_v57 = vrot.slane %v599_v56, 7 }
 0x228   :  { %v603_v58 = vsub.f32 %v598_v54, %v601_v57  ;;  %v1753_v57 = vld [vmem:[%s2191_s2 + $0x18] sm:$0xff]  }
 0x22a   :  { %v605_v59 = vadd.f32 1e-05, %v603_v58  ;;  %v1754_v58 = vld [vmem:[%s2191_s2 + $0x20] sm:$0xff]  }
 0x22c   :  { %1766 = vrsqrt.f32 %v605_v59  ;;  %v1757_v59 = vld [vmem:[%s2191_s2 + $0x38] sm:$0xff]  }
 0x236   :  { %v1767_v0 = vpop.eup %1766 }
 0x237   :  { %v614_v3 = vrot.slane %v1767_v0, %v2073_v63  ;;  %v1761_v0 = vld [vmem:[%s2191_s2 + $0x98] sm:$0xff]  }
 0x239   :  { %v615_v4 = vcombine.high %v614_v3, %v614_v3  ;;  %v1764_v3 = vld [vmem:[%s2191_s2 + $0xb0] sm:$0xff]  }
 0x23b   :  { %v622_v8 = vrot.slane %v615_v4, %v2073_v63  ;;  %v1765_v4 = vld [vmem:[%s2191_s2 + $0xb8] sm:$0xff]  }
 0x23d   :  { %v624_v10 = vmul.f32 %v622_v8, %v604_v7 }
 0x23f   :  { %v626_v18 = vmul.f32 %v624_v10, %v598_v54  ;;  %v632_v20 = vrot.slane %v624_v10, %v2081_v9 }
 0x241   :  { %v627_v21 = vsub.f32 %v625_v11, %v626_v18  ;;  %v634_v1 = vmul.f32 %v632_v20, %v2026_v14  ;;  %v635_v22 = vmul.f32 %v632_v20, %v2030_v17  ;;  %v636_v23 = vmul.f32 %v2024_v13, %v632_v20  ;;  %v1751_v13 = vld [vmem:[%s2191_s2 + $0x8] sm:$0xff]  }
 0x242   :  { %v637_v24 = vmul.f32 %v2028_v16, %v632_v20 }
 0x243   :  { %v642_v25 = vrot.slane %v627_v21, %v2081_v9 }
 0x245   :  { %v644_v26 = vadd.f32 %v642_v25, %v634_v1  ;;  %v645_v27 = vadd.f32 %v642_v25, %v635_v22  ;;  %v646_v29 = vadd.f32 %v642_v25, %v636_v23  ;;  %v647_v30 = vadd.f32 %v642_v25, %v637_v24 }
 0x247   :  { %v648_v31 = vmax.f32 %v644_v26, 0.0  ;;  %v649_v32 = vmax.f32 %v645_v27, 0.0  ;;  %v650_v33 = vmax.f32 %v646_v29, 0.0  ;;  %v651_v34 = vmax.f32 %v647_v30, 0.0 }
 0x249   :  { %v694_v35 = vpack.c.bf16 %v649_v32, %v648_v31  ;;  %v654_v36 = vrot.slane %v650_v33, 7  ;;  %v667_v37 = vrot.slane %v651_v34, 1  ;;  %v695_v14 = vpack.c.bf16 %v651_v34, %v650_v33 }
 0x24a   :  { %v652_v38 = vrot.slane %v648_v31, 7  ;;  %v653_v17 = vrot.slane %v649_v32, 7  ;;  %v655_v39 = vrot.slane %v651_v34, 7  ;;  %v664_v16 = vrot.slane %v648_v31, 1 }
 0x24b   :  { %1570 = vmatprep.mubr.bf16.mxu1 %v694_v35  ;;  %v665_v40 = vrot.slane %v649_v32, 1  ;;  %v666_v41 = vrot.slane %v650_v33, 1 }
 0x24c   :  { %1571 = vmatmul.mubr.bf16.vlgmr.msra.gmra.mrb[4].mxu1 %v695_v14  ;;  %v658_v42 = vsel %vm131_vm0, %v652_v38, %v653_v17  ;;  %v659_v43 = vsel %vm131_vm0, %v655_v39, %v652_v38  ;;  %v656_v44 = vsel %vm131_vm0, %v654_v36, %v655_v39  ;;  %v657_v45 = vsel %vm131_vm0, %v653_v17, %v654_v36 }
 0x24d   :  { %1575 = vmatpush3.bf16.msra.mxu1 %v1750_v51  ;;  %v1291_v46 = vpack.c.bf16 %v658_v42, %v659_v43  ;;  %v1294_v47 = vpack.c.bf16 %v656_v44, %v657_v45  ;;  %v669_v48 = vsel %vm144_vm4, %v665_v40, %v666_v41  ;;  %v670_v50 = vsel %vm144_vm4, %v664_v16, %v665_v40 }
 0x24e   :  { %1576 = vmatprep.subr.bf16.mxu1 %v1751_v13  ;;  %v1321_v54 = vpack.c.bf16 %v669_v48, %v670_v50  ;;  %v668_v55 = vsel %vm144_vm4, %v666_v41, %v667_v37  ;;  %v671_v51 = vsel %vm144_vm4, %v667_v37, %v664_v16 }
 0x24f   :  { %1590 = vmatprep.mubr.msk.bf16.mxu1 %vm1899_vm3, %v1291_v46  ;;  %v1324_v56 = vpack.c.bf16 %v671_v51, %v668_v55 }
 0x251   :  { %1577 = vmatpush3.bf16.msra.mxu1 %v1751_v13 }
 0x252   :  { %1578 = vmatprep.subr.bf16.mxu1 %v1752_v53 }
 0x255   :  { %1579 = vmatpush3.bf16.msra.mxu1 %v1752_v53  ;;  %v1147_v53 = vld [vmem:[%s2195_s7] sm:$0x1] }
 0x256   :  { %1580 = vmatprep.subr.bf16.mxu1 %v1753_v57 }
 0x259   :  { %1581 = vmatpush3.bf16.msra.mxu1 %v1753_v57 }
 0x25a   :  { %1582 = vmatprep.subr.bf16.mxu1 %v1754_v58 }
 0x25d   :  { %1583 = vmatpush3.bf16.msra.mxu1 %v1754_v58 }
 0x25e   :  { %1584 = vmatprep.subr.bf16.mxu1 %v1755_v12 }
 0x261   :  { %1585 = vmatpush3.bf16.msra.mxu1 %v1755_v12 }
 0x262   :  { %1586 = vmatprep.subr.bf16.mxu1 %v1756_v28 }
 0x265   :  { %1587 = vmatpush3.bf16.msra.mxu1 %v1756_v28 }
 0x266   :  { %1588 = vmatprep.subr.bf16.mxu1 %v1757_v59 }
 0x269   :  { %1589 = vmatpush3.bf16.msra.mxu1 %v1757_v59 }
 0x26a   :  { %1594 = vmatprep.subr.bf16.mxu1 %v1758_v60 }
 0x26c   :  { %1591 = vmatmul.mubr.msk.bf16.vlgmr.msra.gmra.mrb[4].mxu1 %vm1944_vm7, %v1294_v47  ;;  %v1126_v47 = vld [vmem:[%s2194_s6] sm:$0x1] }
 0x26d   :  { %1595 = vmatpush3.bf16.msra.mxu1 %v1758_v60  ;;  %1610 = vmatprep.mubr.msk.bf16.mxu1 %vm1952_vm8, %v1321_v54 }
 0x26e   :  { %1596 = vmatprep.subr.bf16.mxu1 %v1759_v61 }
 0x271   :  { %1597 = vmatpush3.bf16.msra.mxu1 %v1759_v61 }
 0x272   :  { %1598 = vmatprep.subr.bf16.mxu1 %v1760_v62 }
 0x275   :  { %1599 = vmatpush3.bf16.msra.mxu1 %v1760_v62 }
 0x276   :  { %1600 = vmatprep.subr.bf16.mxu1 %v1761_v0 }
 0x279   :  { %1601 = vmatpush3.bf16.msra.mxu1 %v1761_v0 }
 0x27a   :  { %1602 = vmatprep.subr.bf16.mxu1 %v1762_v49 }
 0x27d   :  { %1603 = vmatpush3.bf16.msra.mxu1 %v1762_v49 }
 0x27e   :  { %1604 = vmatprep.subr.bf16.mxu1 %v1763_v52 }
 0x281   :  { %1605 = vmatpush3.bf16.msra.mxu1 %v1763_v52 }
 0x282   :  { %1606 = vmatprep.subr.bf16.mxu1 %v1764_v3 }
 0x285   :  { %1607 = vmatpush3.bf16.msra.mxu1 %v1764_v3 }
 0x286   :  { %1608 = vmatprep.subr.bf16.mxu1 %v1765_v4 }
 0x289   :  { %1609 = vmatpush3.bf16.msra.mxu1 %v1765_v4 }
 0x28c   :  { %1611 = vmatmul.mubr.msk.bf16.vlgmr.msra.gmra.mrb[4].mxu1 %vm1985_vm10, %v1324_v56 }
 0x35f   :  { %v1612_v7 = vpop.f32.mrb[4].mxu1 }
 0x360   :  { %v1008_v8 = vpop.f32.mrb[5].mxu1  ;;  %v1038_v1 = vmul.f32 %v1612_v7, %v1612_v7 }
 0x361   :  { %v1613_v10 = vpop.f32.mrb[6].mxu1  ;;  %v1036_v18 = vmul.f32 %v1008_v8, %v1008_v8 }
 0x362   :  { %v1011_v11 = vpop.f32.mrb[7].mxu1  ;;  %v1039_v24 = vmul.f32 %v1613_v10, %v1613_v10 }
 0x363   :  { %v1027_v20 = vadd.f32 %v1011_v11, %v1008_v8  ;;  %v1037_v21 = vmul.f32 %v1011_v11, %v1011_v11 }
 0x365   :  { %v1028_v22 = vadd.f32 %v1612_v7, %v1027_v20  ;;  %v1040_v23 = vadd.f32 %v1037_v21, %v1036_v18 }
 0x367   :  { %v1029_v25 = vadd.f32 %v1613_v10, %v1028_v22  ;;  %v1041_v26 = vadd.f32 %v1040_v23, %v1038_v1 }
 0x369   :  { %v1030_v27 = vrot.slane %v1029_v25, 4  ;;  %v1042_v29 = vadd.f32 %v1041_v26, %v1039_v24 }
 0x36b   :  { %v1031_v30 = vadd.f32 %v1030_v27, %v1029_v25  ;;  %v1043_v31 = vrot.slane %v1042_v29, 4 }
 0x36d   :  { %v1032_v32 = vrot.slane %v1031_v30, 2  ;;  %v1044_v2 = vadd.f32 %v1043_v31, %v1042_v29 }
 0x36f   :  { %v1033_v33 = vadd.f32 %v1032_v32, %v1031_v30  ;;  %v1045_v34 = vrot.slane %v1044_v2, 2 }
 0x371   :  { %v1034_v35 = vrot.slane %v1033_v33, 1  ;;  %v1046_v36 = vadd.f32 %v1045_v34, %v1044_v2 }
 0x373   :  { %v1047_v37 = vrot.slane %v1046_v36, 1  ;;  %v1035_v14 = vadd.f32 %v1034_v35, %v1033_v33 }
 0x375   :  { %v1048_v38 = vadd.f32 %v1047_v37, %v1046_v36 }
 0x377   :  { %v1049_v17 = vsel %vm526_vm12, %v1035_v14, %v1048_v38 }
 0x378   :  { %1647 = vmatmul.mubr.f32.vlgmr.msra.gmra.mrb[4].mxu0 %v1049_v17 }
 0x44b   :  { %v1116_v39 = vpop.f32.mrb[4].mxu0 }
 0x44c   :  { %v1120_v13 = vmul.f32 0.001953125, %v1116_v39  ;;  %v1648_v16 = vpop.f32.mrb[5].mxu0 }
 0x44e   :  { %v1121_v40 = vmul.f32 %v1120_v13, %v1120_v13 }
 0x450   :  { %v1123_v41 = vrot.slane %v1121_v40, 7 }
 0x452   :  { %v1125_v42 = vsub.f32 %v1120_v13, %v1123_v41 }
 0x454   :  { %v1127_v43 = vadd.f32 1e-05, %v1125_v42 }
 0x456   :  { %1768 = vrsqrt.f32 %v1127_v43 }
 0x460   :  { %v1769_v44 = vpop.eup %1768 }
 0x461   :  { %v1136_v45 = vrot.slane %v1769_v44, %v2073_v63 }
 0x463   :  { %v1137_v46 = vcombine.high %v1136_v45, %v1136_v45 }
 0x465   :  { %v1144_v48 = vrot.slane %v1137_v46, %v2073_v63 }
 0x467   :  { %v1146_v50 = vmul.f32 %v1144_v48, %v1126_v47 }
 0x469   :  { %v1148_v54 = vmul.f32 %v1146_v50, %v1120_v13  ;;  %v1154_v55 = vrot.slane %v1146_v50, %v2081_v9 }
 0x46b   :  { %v1149_v51 = vsub.f32 %v1147_v53, %v1148_v54  ;;  %v1156_v56 = vmul.f32 %v1154_v55, %v1008_v8  ;;  %v1157_v57 = vmul.f32 %v1154_v55, %v1011_v11  ;;  %v1158_v58 = vmul.f32 %v1612_v7, %v1154_v55 }
 0x46c   :  { %v1159_v12 = vmul.f32 %v1613_v10, %v1154_v55 }
 0x46d   :  { %v1164_v28 = vrot.slane %v1149_v51, %v2081_v9 }
 0x46f   :  { %v1166_v59 = vadd.f32 %v1164_v28, %v1156_v56  ;;  %v1167_v60 = vadd.f32 %v1164_v28, %v1157_v57  ;;  %v1168_v61 = vadd.f32 %v1164_v28, %v1158_v58  ;;  %v1169_v62 = vadd.f32 %v1164_v28, %v1159_v12 }
 0x471   :  { %v1170_v63 = vmax.f32 %v1166_v59, 0.0  ;;  %v1171_v0 = vmax.f32 %v1167_v60, 0.0  ;;  %v1172_v49 = vmax.f32 %v1168_v61, 0.0  ;;  %v1173_v52 = vmax.f32 %v1169_v62, 0.0 }
 0x473   :  { %v1174_v3 = vadd.f32 %v1170_v63, %v1836_v5  ;;  %v1175_v4 = vadd.f32 %v1171_v0, %v1841_v6  ;;  %v1176_v18 = vadd.f32 %v1172_v49, %v1872_v19  ;;  %v1177_v8 = vadd.f32 %v1173_v52, %v1863_v15 }
 0x475   :  { %v1178_v7 = vmax.f32 %v1174_v3, 0.0  ;;  %v1179_v10 = vmax.f32 %v1175_v4, 0.0  ;;  %v1180_v11 = vmax.f32 %v1176_v18, 0.0  ;;  %v1181_v9 = vmax.f32 %v1177_v8, 0.0 }
 0x477   :  { %1182 = vst [vmem:[%s2196_s8] sm:$0xff] %v1178_v7  ;;  %1183 = vst [vmem:[%s2196_s8 + $0x8] sm:$0xff] %v1179_v10 }
 0x478   :  { %1184 = vst [vmem:[%s2196_s8 + $0x10] sm:$0xff] %v1180_v11  ;;  %1185 = vst [vmem:[%s2196_s8 + $0x18] sm:$0xff] %v1181_v9 }

</bundles_post_ra>
